<compile_context>
chip_gen: v7x
topology: tpu7x:2x2x1
jax: 0.10.0
libtpu: 0.0.40
codegen_flags: <defaults>
</compile_context>

<pallas_src>
import jax
import jax.numpy as jnp
from jax.experimental import pallas as pl
from jax.experimental.pallas import tpu as pltpu


def _ball_mlp_kernel(x_ref, w1_ref, b1_ref, w2_ref, b2_ref, w3t_ref, b3_ref, o_ref):
    # x_ref: (4, TB) bf16 -- batch on lanes.
    x = x_ref[...]

    # Layer 1: (32,4)bf16 @ (4,TB)bf16 -> (32,TB) f32 acc, bias + ReLU in f32.
    h1 = jnp.dot(w1_ref[...], x, preferred_element_type=jnp.float32)
    h1 = jnp.maximum(h1 + b1_ref[...], 0.0)

    # Layer 2: (16,32)bf16 @ (32,TB)bf16 -> (16,TB) f32 acc, bias + ReLU in f32.
    h2 = jnp.dot(w2_ref[...], h1.astype(jnp.bfloat16),
                 preferred_element_type=jnp.float32)
    h2 = jnp.maximum(h2 + b2_ref[...], 0.0)

    # Layer 3 (1x16): VPU broadcast-multiply + XLU sublane reduce -- skips a
    # third MXU pass per column panel.  w3t_ref is (16,1) f32.
    h3 = jnp.sum(h2 * w3t_ref[...], axis=0, keepdims=True) + b3_ref[...]   # (1,TB)

    o_ref[...] = jnp.tanh(h3).astype(o_ref.dtype)                          # Tanh (EUP)


def ball_only_model(x, params, *, batch_tile=32768):
    """x: (B, F) float32 with F >= 4. Returns (B, 1) float32."""
    w1, b1, w2, b2, w3, b3 = params
    B = x.shape[0]

    # Single fused relayout pass: slice the 4 ball features, cast to bf16,
    # transpose to feature-major (4, B) so batch sits on the lane axis.
    xt = jnp.transpose(x[:, :4].astype(jnp.bfloat16))                      # (4, B)

    # bf16 weights for the MXU; w3 transposed to a (16,1) f32 column for the
    # VPU/XLU layer-3 path.  Biases stay f32 (out, 1).
    w1b = w1.astype(jnp.bfloat16)
    w2b = w2.astype(jnp.bfloat16)
    w3t = jnp.transpose(w3).astype(jnp.float32)                            # (16, 1)

    # Tile: large (amortizes per-step overhead), multiple of 512 lanes (covers
    # v5e 128-wide and v6e/v7x 256-wide MXU column panels), clamped for small B.
    tb = min(batch_tile, 512 * pl.cdiv(B, 512))
    n_tiles = pl.cdiv(B, tb)   # no padding: Pallas masks the partial edge block

    def const(a):
        # Full-array block with a constant index map -> resident across grid.
        return pl.BlockSpec(a.shape, lambda i: (0,) * a.ndim)

    out = pl.pallas_call(
        _ball_mlp_kernel,
        out_shape=jax.ShapeDtypeStruct((1, B), jnp.float32),
        grid=(n_tiles,),
        in_specs=[
            pl.BlockSpec((4, tb), lambda i: (0, i)),                       # x^T tile
            const(w1b), const(b1), const(w2b), const(b2), const(w3t), const(b3),
        ],
        out_specs=pl.BlockSpec((1, tb), lambda i: (0, i)),                 # lane-dense
        compiler_params=pltpu.CompilerParams(
            dimension_semantics=("parallel",),
            vmem_limit_bytes=32 * 1024 * 1024,
        ),
    )(xt, w1b, b1, w2b, b2, w3t, b3)

    # (1, B) row-major == (B, 1) row-major, so this reshape is layout-free.
    return out.reshape(B, 1)


def init_params(key):
    """Deterministic init matching PyTorch nn.Linear(in, out):
    weight (out, in), bias stored as (out, 1) so the kernel computes W @ X + b."""
    def linear(k, fan_in, fan_out):
        kw, kb = jax.random.split(k)
        bound = 1.0 / jnp.sqrt(float(fan_in))  # PyTorch-style uniform bound
        w = jax.random.uniform(kw, (fan_out, fan_in), jnp.float32, -bound, bound)
        b = jax.random.uniform(kb, (fan_out, 1), jnp.float32, -bound, bound)
        return w, b

    k1, k2, k3 = jax.random.split(key, 3)
    w1, b1 = linear(k1, 4, 32)
    w2, b2 = linear(k2, 32, 16)
    w3, b3 = linear(k3, 16, 1)
    return (w1, b1, w2, b2, w3, b3)


def _reference(x, params):
    """Pure-f32 JAX reference of the PyTorch module."""
    w1, b1, w2, b2, w3, b3 = params
    h = x[:, :4]
    h = jnp.maximum(h @ w1.T + b1.T, 0.0)
    h = jnp.maximum(h @ w2.T + b2.T, 0.0)
    return jnp.tanh(h @ w3.T + b3.T)


if __name__ == "__main__":
    key = jax.random.PRNGKey(0)
    kx, kp = jax.random.split(key)
    # Small input consistent with the module: batch=8, 8 features (first 4 = ball).
    x = jax.random.normal(kx, (8, 8), dtype=jnp.float32)
    params = init_params(kp)

    out = ball_only_model(x, params)
    out = jax.block_until_ready(out)

    ref = _reference(x, params)
    assert out.shape == (8, 1)
    # bf16 inputs/weights with f32 accumulation: ~1e-2-scale deviation bound.
    assert jnp.allclose(out, ref, atol=2e-2, rtol=2e-2), float(jnp.max(jnp.abs(out - ref)))
    print("KERNEL_OK")
</pallas_src>

<mosaic_0001>
module attributes {stable_mosaic.version = 11 : i64} {
  func.func @_ball_mlp_kernel(%arg0: i32, %arg1: memref<4x512xbf16, #tpu.memory_space<vmem>>, %arg2: memref<32x4xbf16, #tpu.memory_space<vmem>>, %arg3: memref<32x1xf32, #tpu.memory_space<vmem>>, %arg4: memref<16x32xbf16, #tpu.memory_space<vmem>>, %arg5: memref<16x1xf32, #tpu.memory_space<vmem>>, %arg6: memref<16x1xf32, #tpu.memory_space<vmem>>, %arg7: memref<1x1xf32, #tpu.memory_space<vmem>>, %arg8: memref<1x512xf32, #tpu.memory_space<vmem>>) attributes {dimension_semantics = [#tpu.dimension_semantics<parallel>], iteration_bounds = array<i64: 1>, scalar_prefetch = 0 : i64, scratch_operands = 0 : i64, tpu.core_type = #tpu.core_type<tc>, window_params = [{transform_indices = @transform_0, window_bounds = array<i64: 4, 512>}, {pipeline_mode = #tpu.pipeline_mode<synchronous>, transform_indices = @transform_1, window_bounds = array<i64: 32, 4>}, {pipeline_mode = #tpu.pipeline_mode<synchronous>, transform_indices = @transform_2, window_bounds = array<i64: 32, 1>}, {pipeline_mode = #tpu.pipeline_mode<synchronous>, transform_indices = @transform_3, window_bounds = array<i64: 16, 32>}, {pipeline_mode = #tpu.pipeline_mode<synchronous>, transform_indices = @transform_4, window_bounds = array<i64: 16, 1>}, {pipeline_mode = #tpu.pipeline_mode<synchronous>, transform_indices = @transform_5, window_bounds = array<i64: 16, 1>}, {pipeline_mode = #tpu.pipeline_mode<synchronous>, transform_indices = @transform_6, window_bounds = array<i64: 1, 1>}, {transform_indices = @transform_7, window_bounds = array<i64: 1, 512>}]} {
    %c0 = arith.constant 0 : index
    %c0_0 = arith.constant 0 : index
    %0 = vector.load %arg1[%c0, %c0_0] : memref<4x512xbf16, #tpu.memory_space<vmem>>, vector<4x512xbf16>
    %c0_1 = arith.constant 0 : index
    %c0_2 = arith.constant 0 : index
    %1 = vector.load %arg2[%c0_1, %c0_2] : memref<32x4xbf16, #tpu.memory_space<vmem>>, vector<32x4xbf16>
    %cst = arith.constant dense<0.000000e+00> : vector<32x512xf32>
    %2 = tpu.matmul %1, %0, %cst {dimension_numbers = #tpu.dot_dimension_numbers<[1], [0], [0], [1], [0, 0, 1, 1], [], []>} : vector<32x4xbf16>, vector<4x512xbf16>, vector<32x512xf32> -> vector<32x512xf32>
    %c0_3 = arith.constant 0 : index
    %c0_4 = arith.constant 0 : index
    %3 = vector.load %arg3[%c0_3, %c0_4] : memref<32x1xf32, #tpu.memory_space<vmem>>, vector<32x1xf32>
    %4 = vector.broadcast %3 : vector<32x1xf32> to vector<32x512xf32>
    %5 = arith.addf %2, %4 : vector<32x512xf32>
    %cst_5 = arith.constant 0.000000e+00 : f32
    %6 = vector.broadcast %cst_5 : f32 to vector<32x512xf32>
    %7 = arith.maximumf %5, %6 : vector<32x512xf32>
    %c0_6 = arith.constant 0 : index
    %c0_7 = arith.constant 0 : index
    %8 = vector.load %arg4[%c0_6, %c0_7] : memref<16x32xbf16, #tpu.memory_space<vmem>>, vector<16x32xbf16>
    %9 = arith.truncf %7 : vector<32x512xf32> to vector<32x512xbf16>
    %cst_8 = arith.constant dense<0.000000e+00> : vector<16x512xf32>
    %10 = tpu.matmul %8, %9, %cst_8 {dimension_numbers = #tpu.dot_dimension_numbers<[1], [0], [0], [1], [0, 0, 1, 1], [], []>} : vector<16x32xbf16>, vector<32x512xbf16>, vector<16x512xf32> -> vector<16x512xf32>
    %c0_9 = arith.constant 0 : index
    %c0_10 = arith.constant 0 : index
    %11 = vector.load %arg5[%c0_9, %c0_10] : memref<16x1xf32, #tpu.memory_space<vmem>>, vector<16x1xf32>
    %12 = vector.broadcast %11 : vector<16x1xf32> to vector<16x512xf32>
    %13 = arith.addf %10, %12 : vector<16x512xf32>
    %cst_11 = arith.constant 0.000000e+00 : f32
    %14 = vector.broadcast %cst_11 : f32 to vector<16x512xf32>
    %15 = arith.maximumf %13, %14 : vector<16x512xf32>
    %c0_12 = arith.constant 0 : index
    %c0_13 = arith.constant 0 : index
    %16 = vector.load %arg6[%c0_12, %c0_13] : memref<16x1xf32, #tpu.memory_space<vmem>>, vector<16x1xf32>
    %17 = vector.broadcast %16 : vector<16x1xf32> to vector<16x512xf32>
    %18 = arith.mulf %15, %17 : vector<16x512xf32>
    %cst_14 = arith.constant dense<0.000000e+00> : vector<512xf32>
    %19 = vector.multi_reduction <add>, %18, %cst_14 [0] : vector<16x512xf32> to vector<512xf32>
    %20 = vector.shape_cast %19 : vector<512xf32> to vector<1x512xf32>
    %c0_15 = arith.constant 0 : index
    %c0_16 = arith.constant 0 : index
    %21 = vector.load %arg7[%c0_15, %c0_16] : memref<1x1xf32, #tpu.memory_space<vmem>>, vector<1x1xf32>
    %22 = vector.broadcast %21 : vector<1x1xf32> to vector<1x512xf32>
    %23 = arith.addf %20, %22 : vector<1x512xf32>
    %24 = math.tanh %23 : vector<1x512xf32>
    %c0_17 = arith.constant 0 : index
    %c0_18 = arith.constant 0 : index
    %25 = vector.load %arg8[%c0_17, %c0_18] : memref<1x512xf32, #tpu.memory_space<vmem>>, vector<1x512xf32>
    tpu.vector_store %arg8[%c0_17, %c0_18], %24 {strides = array<i32>} : memref<1x512xf32, #tpu.memory_space<vmem>>, vector<1x512xf32>,
    return
  }
  func.func @transform_0(%arg0: i32) -> (i32, i32) {
    %c0_i32 = arith.constant 0 : i32
    %c0_i32_0 = arith.constant 0 : i32
    return %c0_i32, %arg0 : i32, i32
  }
  func.func @transform_1(%arg0: i32) -> (i32, i32) {
    %c0_i32 = arith.constant 0 : i32
    %c0_i32_0 = arith.constant 0 : i32
    %c0_i32_1 = arith.constant 0 : i32
    return %c0_i32, %c0_i32_0 : i32, i32
  }
  func.func @transform_2(%arg0: i32) -> (i32, i32) {
    %c0_i32 = arith.constant 0 : i32
    %c0_i32_0 = arith.constant 0 : i32
    %c0_i32_1 = arith.constant 0 : i32
    return %c0_i32, %c0_i32_0 : i32, i32
  }
  func.func @transform_3(%arg0: i32) -> (i32, i32) {
    %c0_i32 = arith.constant 0 : i32
    %c0_i32_0 = arith.constant 0 : i32
    %c0_i32_1 = arith.constant 0 : i32
    return %c0_i32, %c0_i32_0 : i32, i32
  }
  func.func @transform_4(%arg0: i32) -> (i32, i32) {
    %c0_i32 = arith.constant 0 : i32
    %c0_i32_0 = arith.constant 0 : i32
    %c0_i32_1 = arith.constant 0 : i32
    return %c0_i32, %c0_i32_0 : i32, i32
  }
  func.func @transform_5(%arg0: i32) -> (i32, i32) {
    %c0_i32 = arith.constant 0 : i32
    %c0_i32_0 = arith.constant 0 : i32
    %c0_i32_1 = arith.constant 0 : i32
    return %c0_i32, %c0_i32_0 : i32, i32
  }
  func.func @transform_6(%arg0: i32) -> (i32, i32) {
    %c0_i32 = arith.constant 0 : i32
    %c0_i32_0 = arith.constant 0 : i32
    %c0_i32_1 = arith.constant 0 : i32
    return %c0_i32, %c0_i32_0 : i32, i32
  }
  func.func @transform_7(%arg0: i32) -> (i32, i32) {
    %c0_i32 = arith.constant 0 : i32
    %c0_i32_0 = arith.constant 0 : i32
    return %c0_i32, %arg0 : i32, i32
  }
}

</mosaic_0001>

<bundles_post_ra>
// kernel: tpu_custom_call.1
= control target key start
LH: loop header
LB: loop body
LE: loop exit
PB: predicated region body
PF: predicated region fallthrough
CT: control target
= control target key end

     0   :  { %s623_s0 = inlined_call_operand.vmem [shape: bf16[4,8], index: 0, kind: input, shape index: {}]   ;;  %s624_s1 = inlined_call_operand.vmem [shape: bf16[32,4], index: 1, kind: input, shape index: {}]   ;;  %s625_s2 = inlined_call_operand.vmem [shape: f32[32,1], index: 2, kind: input, shape index: {}]   ;;  %s626_s3 = inlined_call_operand.vmem [shape: bf16[16,32], index: 3, kind: input, shape index: {}]   ;;  %s627_s4 = inlined_call_operand.vmem [shape: f32[16,1], index: 4, kind: input, shape index: {}]   ;;  %s628_s5 = inlined_call_operand.vmem [shape: f32[16,1], index: 5, kind: input, shape index: {}]   ;;  %s629_s6 = inlined_call_operand.<no memory space> [shape: f32[1,1], index: 6, kind: input, shape index: {}]   ;;  %s630_s7 = inlined_call_operand.hbm [shape: f32[1,8], index: 7, kind: output, shape index: {}]  }
   0x1   :  { %v12_v0 = vstv %s629_s6 }
   0x2   :  { %13 = vst [vmem:[#allocation2] sm:$0x1] %v12_v0 }
   0x3   :  { %14 = vsyncpa [#allocation4], 0  ;;  %v30_v1 = vld [vmem:[%s623_s0] sm:$0xff]  ;;  %v74_v2 = vlaneseq  ;;  %v521_v3 = vmov 1983009808   ;;  %v522_v6 = vmov 0  }
   0x4   :  { %v72_v4 = vunpack.c.l.s4 %v521_v3  ;;  %139 = vmatprep.mubr.bf16.mxu0 %v522_v6  ;;  %192 = vmatprep.mubr.bf16.mxu1 %v522_v6  ;;  %v70_v8 = vcombine.high %v30_v1, %v30_v1  ;;  %v35_v9 = vld [vmem:[%s625_s2] sm:$0xff]  ;;  %v37_v10 = vld [vmem:[%s625_s2 + $0x10] sm:$0xff]  ;;  %v36_v12 = vld [vmem:[%s625_s2 + $0x8] sm:$0xff]  ;;  %vm94_vm0 = vcmask 1041408   ;;  %vm87_vm1 = vcmask 31744  }
   0x5   :  { %v572_v5 = vshrl.u32 %v74_v2, 7  ;;  %483 = vset.pattern.permute.xlu0 %v522_v6  ;;  %484 = vset.pattern.permute.xlu1 %v522_v6  ;;  %v38_v13 = vld [vmem:[%s625_s2 + $0x18] sm:$0xff]  ;;  %v239_v20 = vld [vmem:[%s627_s4] sm:$0xff]  ;;  %v240_v21 = vld [vmem:[%s627_s4 + $0x8] sm:$0xff]  ;;  %vm256_vm2 = vcmask 261120   ;;  %vm451_vm3 = vcmp.lt.s32.totalorder %v74_v2, 512 }
   0x6   :  { %v73_v7 = vunpack.c.0.s8 %v72_v4  ;;  %41 = vperm.xlu0 %483, %v35_v9   ;;  %51 = vperm.xlu1 %484, %v37_v10   ;;  %v486_v22 = vld [vmem:[%s624_s1] sm:$0xff]   ;;  %v355_v24 = vld [vmem:[%s628_s5 + $0x8] sm:$0xff] }
   0x7   :  { %v354_v23 = vld [vmem:[%s628_s5] sm:$0xff]  ;;  %v487_v26 = vld [vmem:[%s624_s1 + $0x8] sm:$0xff]  }
   0x8   :  { %v76_v11 = vsub.s32 %v73_v7, %v572_v5 }
   0x9   :  { %v402_v25 = vld [vmem:[#allocation2] sm:$0x1] }
   0xa   :  { %v77_v14 = vrot.slane %v30_v1, %v76_v11  ;;  %v84_v15 = vrot.slane %v70_v8, %v76_v11  ;;  %46 = vperm.xlu0 %483, %v36_v12   ;;  %56 = vperm.xlu1 %484, %v38_v13  }
   0xc   :  { %v85_v16 = vcombine.high %v77_v14, %v77_v14  ;;  %v86_v17 = vcombine.high %v84_v15, %v84_v15  ;;  %v96_v18 = vsel %vm94_vm0, %v77_v14, 0  ;;  %v102_v19 = vsel %vm94_vm0, %v84_v15, 0 }
   0xe   :  { %470 = vmatprep.subr.msk.bf16.mxu0 %vm94_vm0, %v85_v16  ;;  %473 = vmatprep.subr.msk.bf16.mxu1 %vm94_vm0, %v86_v17 }
   0xf   :  { %108 = vmatpush1.bf16.msra.mxu0 %v96_v18  ;;  %161 = vmatpush1.bf16.msra.mxu1 %v102_v19 }
  0x10   :  { %243 = vperm.xlu0 %483, %v239_v20   ;;  %248 = vperm.xlu1 %484, %v240_v21  }
  0x12   :  { %471 = vmatmul.mubr.msk.bf16.vlgmr.msra.gmra.mrb[0].mxu0 %vm87_vm1, %v486_v22  ;;  %474 = vmatmul.mubr.msk.bf16.vlgmr.msra.gmra.mrb[0].mxu1 %vm87_vm1, %v486_v22 }
  0x13   :  { %149 = vmatprep.mubr.bf16.mxu0 %v522_v6  ;;  %202 = vmatprep.mubr.bf16.mxu1 %v522_v6 }
  0x14   :  { %358 = vperm.xlu0 %483, %v354_v23   ;;  %363 = vperm.xlu1 %484, %v355_v24  }
  0x18   :  { %405 = vperm.xlu0 %483, %v402_v25   ;;  %v488_v25 = vld [vmem:[%s626_s3] sm:$0xff]  }
  0x1a   :  { %472 = vmatmul.mubr.msk.bf16.gmra.mrb[4].mxu0 %vm87_vm1, %v487_v26  ;;  %475 = vmatmul.mubr.msk.bf16.gmra.mrb[4].mxu1 %vm87_vm1, %v487_v26 }
  0x1b   :  { %292 = vmatprep.mubr.bf16.mxu0 %v522_v6  ;;  %335 = vmatprep.mubr.bf16.mxu1 %v522_v6 }
  0x85   :  { %v42_v27 = vpop.permute.xlu0 %41  ;;  %v52_v29 = vpop.permute.xlu1 %51 }
  0x89   :  { %v47_v28 = vpop.permute.xlu0 %46  ;;  %v57_v54 = vpop.permute.xlu1 %56 }
  0x8f   :  { %v244_v26 = vpop.permute.xlu0 %243 }
  0xe5   :  { %v141_v30 = vpop.f32.mrb[0].mxu0  ;;  %v194_v31 = vpop.f32.mrb[0].mxu1 }
  0xe6   :  { %v142_v32 = vadd.f32 %v141_v30, %v42_v27  ;;  %v195_v33 = vadd.f32 %v194_v31, %v42_v27  ;;  %v143_v34 = vpop.f32.mrb[1].mxu0  ;;  %v196_v35 = vpop.f32.mrb[1].mxu1 }
  0xe7   :  { %v144_v36 = vadd.f32 %v143_v34, %v42_v27  ;;  %v197_v37 = vadd.f32 %v196_v35, %v42_v27  ;;  %v145_v38 = vpop.f32.mrb[2].mxu0  ;;  %v198_v39 = vpop.f32.mrb[2].mxu1 }
  0xe8   :  { %v146_v40 = vadd.f32 %v145_v38, %v47_v28  ;;  %v199_v41 = vadd.f32 %v198_v39, %v47_v28  ;;  %v147_v42 = vpop.f32.mrb[3].mxu0  ;;  %v200_v43 = vpop.f32.mrb[3].mxu1  ;;  %v213_v46 = vmax.f32 %v142_v32, 0.0  ;;  %v215_v47 = vmax.f32 %v195_v33, 0.0 }
  0xe9   :  { %v148_v44 = vadd.f32 %v147_v42, %v47_v28  ;;  %v201_v45 = vadd.f32 %v200_v43, %v47_v28  ;;  %v214_v50 = vmax.f32 %v144_v36, 0.0  ;;  %v216_v51 = vmax.f32 %v197_v37, 0.0  ;;  %v249_v27 = vpop.permute.xlu1 %248 }
  0xea   :  { %v217_v48 = vmax.f32 %v146_v40, 0.0  ;;  %v219_v49 = vmax.f32 %v199_v41, 0.0 }
  0xeb   :  { %v218_v52 = vmax.f32 %v148_v44, 0.0  ;;  %v220_v53 = vmax.f32 %v201_v45, 0.0 }
  0xec   :  { %v231_v55 = vpack.c.bf16 %v217_v48, %v213_v46  ;;  %v233_v56 = vpack.c.bf16 %v219_v49, %v215_v47 }
  0xed   :  { %v232_v57 = vpack.c.bf16 %v218_v52, %v214_v50  ;;  %v234_v58 = vpack.c.bf16 %v220_v53, %v216_v51  ;;  %v151_v59 = vpop.f32.mrb[4].mxu0  ;;  %v204_v60 = vpop.f32.mrb[4].mxu1 }
  0xee   :  { %v152_v61 = vadd.f32 %v151_v59, %v52_v29  ;;  %v205_v62 = vadd.f32 %v204_v60, %v52_v29  ;;  %v153_v63 = vpop.f32.mrb[5].mxu0  ;;  %v206_v0 = vpop.f32.mrb[5].mxu1 }
  0xef   :  { %v154_v1 = vadd.f32 %v153_v63, %v52_v29  ;;  %v207_v3 = vadd.f32 %v206_v0, %v52_v29  ;;  %v155_v4 = vpop.f32.mrb[6].mxu0  ;;  %v208_v6 = vpop.f32.mrb[6].mxu1  ;;  %260 = vmatprep.subr.bf16.mxu0 %v232_v57  ;;  %303 = vmatprep.subr.bf16.mxu1 %v234_v58 }
  0xf0   :  { %v156_v7 = vadd.f32 %v155_v4, %v57_v54  ;;  %v209_v8 = vadd.f32 %v208_v6, %v57_v54  ;;  %v157_v9 = vpop.f32.mrb[7].mxu0  ;;  %v210_v10 = vpop.f32.mrb[7].mxu1  ;;  %261 = vmatpush1.bf16.msra.mxu0 %v231_v55  ;;  %304 = vmatpush1.bf16.msra.mxu1 %v233_v56  ;;  %v221_v13 = vmax.f32 %v152_v61, 0.0  ;;  %v223_v14 = vmax.f32 %v205_v62, 0.0 }
  0xf1   :  { %v158_v11 = vadd.f32 %v157_v9, %v57_v54  ;;  %v211_v12 = vadd.f32 %v210_v10, %v57_v54  ;;  %v222_v17 = vmax.f32 %v154_v1, 0.0  ;;  %v224_v18 = vmax.f32 %v207_v3, 0.0  ;;  %v359_v50 = vpop.permute.xlu0 %358  ;;  %v364_v51 = vpop.permute.xlu1 %363 }
  0xf2   :  { %v225_v15 = vmax.f32 %v156_v7, 0.0  ;;  %v227_v16 = vmax.f32 %v209_v8, 0.0 }
  0xf3   :  { %v226_v19 = vmax.f32 %v158_v11, 0.0  ;;  %v228_v20 = vmax.f32 %v211_v12, 0.0 }
  0xf4   :  { %v235_v21 = vpack.c.bf16 %v225_v15, %v221_v13  ;;  %v237_v22 = vpack.c.bf16 %v227_v16, %v223_v14  ;;  %v410_v16 = vsub.s32 0, %v572_v5 }
  0xf5   :  { %v236_v23 = vpack.c.bf16 %v226_v19, %v222_v17  ;;  %v238_v24 = vpack.c.bf16 %v228_v20, %v224_v18  ;;  %v406_v19 = vpop.permute.xlu0 %405 }
  0xf7   :  { %262 = vmatprep.subr.bf16.mxu0 %v236_v23  ;;  %305 = vmatprep.subr.bf16.mxu1 %v238_v24 }
  0xf8   :  { %263 = vmatpush1.bf16.msra.mxu0 %v235_v21  ;;  %306 = vmatpush1.bf16.msra.mxu1 %v237_v22 }
  0xfb   :  { %477 = vmatmul.mubr.msk.bf16.vlgmr.msra.gmra.mrb[8].mxu0 %vm256_vm2, %v488_v25  ;;  %478 = vmatmul.mubr.msk.bf16.vlgmr.msra.gmra.mrb[8].mxu1 %vm256_vm2, %v488_v25 }
 0x1ce   :  { %v294_v28 = vpop.f32.mrb[8].mxu0  ;;  %v337_v29 = vpop.f32.mrb[8].mxu1 }
 0x1cf   :  { %v295_v30 = vadd.f32 %v294_v28, %v244_v26  ;;  %v338_v31 = vadd.f32 %v337_v29, %v244_v26  ;;  %v296_v32 = vpop.f32.mrb[9].mxu0  ;;  %v339_v33 = vpop.f32.mrb[9].mxu1 }
 0x1d0   :  { %v297_v34 = vadd.f32 %v296_v32, %v244_v26  ;;  %v340_v35 = vadd.f32 %v339_v33, %v244_v26  ;;  %v298_v36 = vpop.f32.mrb[10].mxu0  ;;  %v341_v37 = vpop.f32.mrb[10].mxu1  ;;  %v411_v26 = vrot.slane %v406_v19, %v410_v16 }
 0x1d1   :  { %v346_v38 = vmax.f32 %v295_v30, 0.0  ;;  %v348_v39 = vmax.f32 %v338_v31, 0.0  ;;  %v299_v40 = vadd.f32 %v298_v36, %v249_v27  ;;  %v342_v41 = vadd.f32 %v341_v37, %v249_v27  ;;  %v300_v42 = vpop.f32.mrb[11].mxu0  ;;  %v343_v43 = vpop.f32.mrb[11].mxu1 }
 0x1d2   :  { %v347_v44 = vmax.f32 %v297_v34, 0.0  ;;  %v349_v45 = vmax.f32 %v340_v35, 0.0  ;;  %v301_v46 = vadd.f32 %v300_v42, %v249_v27  ;;  %v344_v47 = vadd.f32 %v343_v43, %v249_v27 }
 0x1d3   :  { %v350_v48 = vmax.f32 %v299_v40, 0.0  ;;  %v352_v49 = vmax.f32 %v342_v41, 0.0  ;;  %v366_v54 = vmul.f32 %v359_v50, %v346_v38  ;;  %v368_v55 = vmul.f32 %v359_v50, %v348_v39 }
 0x1d4   :  { %v351_v52 = vmax.f32 %v301_v46, 0.0  ;;  %v353_v53 = vmax.f32 %v344_v47, 0.0  ;;  %v367_v58 = vmul.f32 %v359_v50, %v347_v44  ;;  %v369_v59 = vmul.f32 %v359_v50, %v349_v45 }
 0x1d5   :  { %v370_v56 = vmul.f32 %v364_v51, %v350_v48  ;;  %v372_v57 = vmul.f32 %v364_v51, %v352_v49  ;;  %v523_v35 = vmov 1966171168  }
 0x1d6   :  { %v371_v60 = vmul.f32 %v364_v51, %v351_v52  ;;  %v373_v61 = vmul.f32 %v364_v51, %v353_v53  ;;  %v427_v36 = vunpack.c.l.s4 %v523_v35 }
 0x1d7   :  { %v374_v62 = vadd.f32 %v370_v56, %v366_v54  ;;  %v388_v63 = vadd.f32 %v372_v57, %v368_v55 }
 0x1d8   :  { %v381_v0 = vadd.f32 %v371_v60, %v367_v58  ;;  %v395_v1 = vadd.f32 %v373_v61, %v369_v59  ;;  %v428_v37 = vunpack.c.0.s8 %v427_v36 }
 0x1d9   :  { %v375_v3 = vrot.slane %v374_v62, 4  ;;  %v389_v4 = vrot.slane %v388_v63, 4 }
 0x1da   :  { %v382_v6 = vrot.slane %v381_v0, 4  ;;  %v396_v7 = vrot.slane %v395_v1, 4  ;;  %v431_v40 = vsub.s32 %v428_v37, %v572_v5 }
 0x1db   :  { %v376_v8 = vadd.f32 %v375_v3, %v374_v62  ;;  %v390_v9 = vadd.f32 %v389_v4, %v388_v63 }
 0x1dc   :  { %v383_v10 = vadd.f32 %v382_v6, %v381_v0  ;;  %v397_v11 = vadd.f32 %v396_v7, %v395_v1 }
 0x1dd   :  { %v377_v12 = vrot.slane %v376_v8, 2  ;;  %v391_v13 = vrot.slane %v390_v9, 2 }
 0x1de   :  { %v384_v14 = vrot.slane %v383_v10, 2  ;;  %v398_v15 = vrot.slane %v397_v11, 2 }
 0x1df   :  { %v378_v17 = vadd.f32 %v377_v12, %v376_v8  ;;  %v392_v18 = vadd.f32 %v391_v13, %v390_v9 }
 0x1e0   :  { %v385_v20 = vadd.f32 %v384_v14, %v383_v10  ;;  %v399_v21 = vadd.f32 %v398_v15, %v397_v11 }
 0x1e1   :  { %v379_v22 = vrot.slane %v378_v17, 1  ;;  %v393_v23 = vrot.slane %v392_v18, 1 }
 0x1e2   :  { %v386_v24 = vrot.slane %v385_v20, 1  ;;  %v400_v25 = vrot.slane %v399_v21, 1 }
 0x1e3   :  { %v380_v27 = vadd.f32 %v379_v22, %v378_v17  ;;  %v394_v28 = vadd.f32 %v393_v23, %v392_v18 }
 0x1e4   :  { %v387_v29 = vadd.f32 %v386_v24, %v385_v20  ;;  %v401_v30 = vadd.f32 %v400_v25, %v399_v21 }
 0x1e5   :  { %v412_v31 = vadd.f32 %v411_v26, %v380_v27  ;;  %v414_v32 = vadd.f32 %v411_v26, %v394_v28 }
 0x1e6   :  { %v413_v33 = vadd.f32 %v411_v26, %v387_v29  ;;  %v415_v34 = vadd.f32 %v411_v26, %v401_v30 }
 0x1e7   :  { %489 = vtanh.f32 %v412_v31 }
 0x1e8   :  { %491 = vtanh.f32 %v414_v32 }
 0x1e9   :  { %493 = vtanh.f32 %v413_v33 }
 0x1ea   :  { %495 = vtanh.f32 %v415_v34 }
 0x1f1   :  { %v490_v38 = vpop.eup %489 }
 0x1f2   :  { %v492_v39 = vpop.eup %491 }
 0x1f3   :  { %v494_v41 = vpop.eup %493 }
 0x1f4   :  { %v496_v42 = vpop.eup %495  ;;  %v424_v43 = vcombine.low %v490_v38, %v494_v41 }
 0x1f5   :  { %v425_v44 = vcombine.low %v492_v39, %v496_v42 }
 0x1f6   :  { %v432_v45 = vrot.slane %v424_v43, %v431_v40 }
 0x1f7   :  { %v439_v46 = vrot.slane %v425_v44, %v431_v40 }
 0x1f9   :  { %v440_v47 = vcombine.low %v432_v45, %v439_v46 }
 0x1fb   :  { %v447_v48 = vrot.slane %v440_v47, %v431_v40 }
 0x1fd   :  { %453 = vst.msk [vmem:[#allocation3] sm:$0xf] %vm451_vm3, %v447_v48 }
 0x1fe   :  { %458 = vsyncadd [#allocation4], 48  ;;  %s524_s3 = smov [#allocation3]  }
 0x1ff   :  { %s460_s21 = sshll.u32 %s524_s3, 4  ;;  %s461_s21 = int_to_ptr.vmem [resolvable:$true] %s460_s21 }
 0x200   :  { %s497_s22 = scalar_lea.vmem %s461_s21, 16  ;;  %s501_s23 = scalar_lea.vmem %s461_s21, 64 }
 0x201   :  { %p498_p0 = scmp.ne.s32.totalorder %s461_s21, %s497_s22  ;;  %p502_p1 = scmp.lt.s32.totalorder %s461_s21, %s461_s21 }
 0x202   :  { %p503_p2 = scmp.lt.s32.totalorder %s501_s23, %s497_s22 }
 0x204   :  { %p504_p3 = por %p503_p2, %p502_p1 }
 0x206   :  { %p505_p4 = pnand %p504_p3, %p498_p0 }
 0x208   :  { %508 = shalt.err (!%p505_p4)
}
 0x209   :  { %s509_s26 = scalar_lea.hbm %s630_s7, 16 }
 0x20a   :  { %p510_p5 = scmp.ne.s32.totalorder %s630_s7, %s509_s26  ;;  %p513_p6 = scmp.lt.u32.totalorder %s509_s26, %s630_s7 }
 0x20c   :  { %p515_p7 = pnand %p513_p6, %p510_p5 }
 0x20e   :  { %518 = shalt.err (!%p515_p7)
}
 0x20f   :  { %463 = dma.vmem_to_hbm [thread:$0]  %s461_s21, 16, %s630_s7, [#allocation4]  }
 0x210   :  { %519 = dma.done.wait [#allocation4], 64  }
 0x211   :  { %520 = vsyncadd [#allocation4], 4294967232 }
 0x212   :  { %467 = vsyncpa [#allocation4], 1 }

</bundles_post_ra>
